<compile_context>
chip_gen: v6e
topology: v6e:2x2x1
jax: 0.10.0
libtpu: 0.0.40
codegen_flags: <defaults>
</compile_context>

<pallas_src>
import jax
import jax.numpy as jnp
from jax.experimental import pallas as pl
from jax.experimental.pallas import tpu as pltpu


# ---------------------------------------------------------------------------
# Generation-aware sizing helpers
# ---------------------------------------------------------------------------

def _vmem_budgets():
    """Return (vmem_limit_bytes, tile_budget_bytes, per_tile_target_bytes)."""
    try:
        phys = int(pltpu.get_tpu_info().vmem_capacity_bytes)
    except Exception:  # interpret mode / older runtime -> conservative (v7x)
        phys = 64 * 1024 * 1024
    if phys >= 128 * 1024 * 1024:        # v5e / v6e (128 MiB physical VMEM)
        return 64 * 1024 * 1024, 48 * 1024 * 1024, 8 * 1024 * 1024
    # v7x-class parts (64 MiB physical VMEM): keep the 32 MiB scoped limit.
    return 32 * 1024 * 1024, 24 * 1024 * 1024, 4 * 1024 * 1024


def _choose_layout(C, HW):
    """Pick the flattened layout so the lane (last) dim is 128-friendly."""
    if HW % 128 == 0:
        return "chw", HW                          # lane = HW
    if C % 128 == 0:
        return "hwc", HW                          # lane = C, sublane = HW
    # Neither is lane-friendly: keep channels-first, zero-pad HW up to 128.
    return "chw", ((HW + 127) // 128) * 128


def _choose_block_batch(B, C, hw_total, itemsize, tile_budget, tile_target):
    """Return (batch elements per grid step, single-slab-fits-in-VMEM?)."""
    bytes_per_batch = C * hw_total * itemsize
    fits = 4 * bytes_per_batch <= tile_budget          # 2x in + 2x out buffers
    cap = max(1, tile_budget // (4 * bytes_per_batch))
    target = max(1, tile_target // bytes_per_batch)
    # Keep at least min(B, 4) grid steps: input/output pipelining plus work
    # for v7x's second TensorCore under dimension_semantics=("parallel",).
    steps_wanted = min(B, 4)
    bb_for_steps = max(1, B // steps_wanted)
    bb = max(1, min(cap, target, bb_for_steps))
    return bb, fits


def _choose_hw_chunk(C, HW, itemsize, tile_budget, tile_target, layout):
    """Spatial chunk size for the two-pass path (lane/sublane aligned)."""
    bytes_per_row = C * itemsize
    max_chunk = max(1, tile_budget // (4 * bytes_per_row))
    want_chunk = max(1, tile_target // bytes_per_row)
    chunk = max(1, min(max_chunk, want_chunk, HW))
    align = 128 if layout == "chw" else 8      # chunked axis is lanes vs sublanes
    chunk = max(align, (chunk // align) * align)
    return chunk


# ---------------------------------------------------------------------------
# Kernel bodies
# ---------------------------------------------------------------------------

def _excite(pooled, w1, b1, w2, b2, use_mxu):
    """1 + sigmoid(relu(pooled @ w1 + b1) @ w2 + b2), all f32. pooled: (bb, C)."""
    if use_mxu:
        # Fine for multi-MiB tiles: one small MXU pass per step, latency hidden
        # under the HBM stream of the x tile (kernel is memory bound).
        h = jnp.dot(pooled, w1, preferred_element_type=jnp.float32) + b1
        h = jnp.maximum(h, 0.0)
        s = jnp.dot(h, w2, preferred_element_type=jnp.float32) + b2
    else:
        # Tiny Cr (e.g. reduction=16 on small C): a (bb,C)x(C,Cr) matmul uses
        # <1% of the MXU but still pays fixed push/pop latency per grid step,
        # so do it on the VPU/XLU (broadcast-mul + reduce).
        h = jnp.sum(pooled[:, :, None] * w1[None, :, :], axis=1) + b1
        h = jnp.maximum(h, 0.0)
        s = jnp.sum(h[:, :, None] * w2[None, :, :], axis=1) + b2
    return 1.0 + 1.0 / (1.0 + jnp.exp(-s))             # 1 + sigmoid(s)


def _make_fused_kernel(layout, true_hw, use_mxu):
    """Single-pass kernel: pool -> excite -> scale, one batch block per step."""
    inv_hw = 1.0 / float(true_hw)                      # compile-time reciprocal
    reduce_axis = 2 if layout == "chw" else 1

    def kernel(x_ref, w1_ref, b1_ref, w2_ref, b2_ref, o_ref):
        # Squeeze: global average pool (f32 accumulation, zeros in any HW pad
        # do not bias the mean because we divide by the true HW).
        pooled = jnp.sum(x_ref[...].astype(jnp.float32), axis=reduce_axis) * inv_hw
        # Excitation (f32, weights are tiny and resident in VMEM).
        scale = _excite(pooled,
                        w1_ref[...].astype(jnp.float32),
                        b1_ref[...].astype(jnp.float32),
                        w2_ref[...].astype(jnp.float32),
                        b2_ref[...].astype(jnp.float32),
                        use_mxu)                        # (bb, C)
        # Scale + residual: x + x*s == x * (1 + s); x re-read from VMEM so the
        # big tile's live range stays short (no vreg spills).
        if layout == "chw":
            y = x_ref[...].astype(jnp.float32) * scale[:, :, None]
        else:  # "hwc": C is the lane dim -> stride-0 sublane broadcast, no relayout
            y = x_ref[...].astype(jnp.float32) * scale[:, None, :]
        o_ref[...] = y.astype(o_ref.dtype)

    return kernel


def _make_pool_excite_kernel(layout, true_hw, use_mxu):
    """Two-pass path, pass 1: accumulate pool over HW chunks, emit scale."""
    inv_hw = 1.0 / float(true_hw)
    reduce_axis = 2 if layout == "chw" else 1

    def kernel(x_ref, w1_ref, b1_ref, w2_ref, b2_ref, scale_ref, acc_ref):
        j = pl.program_id(1)

        @pl.when(j == 0)
        def _init():
            acc_ref[...] = jnp.zeros_like(acc_ref)

        acc_ref[...] += jnp.sum(x_ref[...].astype(jnp.float32), axis=reduce_axis)

        @pl.when(j == pl.num_programs(1) - 1)
        def _finalize():
            pooled = acc_ref[...] * inv_hw              # (1, C) f32
            scale = _excite(pooled,
                            w1_ref[...].astype(jnp.float32),
                            b1_ref[...].astype(jnp.float32),
                            w2_ref[...].astype(jnp.float32),
                            b2_ref[...].astype(jnp.float32),
                            use_mxu)                    # (1, C)
            scale_ref[...] = scale.reshape(scale_ref.shape)

    return kernel


def _make_scale_kernel(layout):
    """Two-pass path, pass 2: stream x and apply out = x * (1 + sigmoid(...))."""

    def kernel(x_ref, scale_ref, o_ref):
        scale = scale_ref[0].astype(jnp.float32)        # (1, C)
        if layout == "chw":
            y = x_ref[...].astype(jnp.float32) * scale[:, :, None]
        else:
            y = x_ref[...].astype(jnp.float32) * scale[:, None, :]
        o_ref[...] = y.astype(o_ref.dtype)

    return kernel


# ---------------------------------------------------------------------------
# pallas_call wrappers
# ---------------------------------------------------------------------------

def _se_block_fused(x_flat, w1, b1_2d, w2, b2_2d, *, layout, true_hw, bb,
                    use_mxu, vmem_limit):
    B = x_flat.shape[0]
    C, Cr = w1.shape
    blk = x_flat.shape[1:]                      # full (C, HW) / (HW, C) dims

    return pl.pallas_call(
        _make_fused_kernel(layout, true_hw, use_mxu),
        out_shape=jax.ShapeDtypeStruct(x_flat.shape, x_flat.dtype),
        grid_spec=pltpu.PrefetchScalarGridSpec(
            num_scalar_prefetch=0,
            grid=(pl.cdiv(B, bb),),
            in_specs=[
                pl.BlockSpec((bb,) + blk, lambda i: (i, 0, 0)),   # x tile
                pl.BlockSpec((C, Cr), lambda i: (0, 0)),          # W1 (full)
                pl.BlockSpec((1, Cr), lambda i: (0, 0)),          # b1
                pl.BlockSpec((Cr, C), lambda i: (0, 0)),          # W2 (full)
                pl.BlockSpec((1, C), lambda i: (0, 0)),           # b2
            ],
            out_specs=pl.BlockSpec((bb,) + blk, lambda i: (i, 0, 0)),
        ),
        compiler_params=pltpu.CompilerParams(
            dimension_semantics=("parallel",),
            vmem_limit_bytes=vmem_limit,
        ),
    )(x_flat, w1, b1_2d, w2, b2_2d)


def _se_block_two_pass(x_flat, w1, b1_2d, w2, b2_2d, *, layout, true_hw,
                       hw_chunk, use_mxu, vmem_limit):
    B = x_flat.shape[0]
    C, Cr = w1.shape
    if layout == "chw":
        hw_total = x_flat.shape[2]
        x_block, x_index = (1, C, hw_chunk), (lambda i, j: (i, 0, j))
    else:
        hw_total = x_flat.shape[1]
        x_block, x_index = (1, hw_chunk, C), (lambda i, j: (i, j, 0))
    n_hw = hw_total // hw_chunk

    w_specs = [
        pl.BlockSpec((C, Cr), lambda i, j: (0, 0)),
        pl.BlockSpec((1, Cr), lambda i, j: (0, 0)),
        pl.BlockSpec((Cr, C), lambda i, j: (0, 0)),
        pl.BlockSpec((1, C), lambda i, j: (0, 0)),
    ]
    # scale is (B, 1, C): keeps the last two block dims equal to the full
    # array dims (layout friendly) while still blocking over batch.
    scale_spec = pl.BlockSpec((1, 1, C), lambda i, j: (i, 0, 0))

    # Pass 1: pooled sum accumulated over HW chunks, then the excitation FC.
    scale = pl.pallas_call(
        _make_pool_excite_kernel(layout, true_hw, use_mxu),
        out_shape=jax.ShapeDtypeStruct((B, 1, C), jnp.float32),
        grid_spec=pltpu.PrefetchScalarGridSpec(
            num_scalar_prefetch=0,
            grid=(B, n_hw),
            in_specs=[pl.BlockSpec(x_block, x_index)] + w_specs,
            out_specs=scale_spec,
            scratch_shapes=[pltpu.VMEM((1, C), jnp.float32)],
        ),
        compiler_params=pltpu.CompilerParams(
            dimension_semantics=("parallel", "arbitrary"),
            vmem_limit_bytes=vmem_limit,
        ),
    )(x_flat, w1, b1_2d, w2, b2_2d)

    # Pass 2: stream x again and apply the per-batch scale.
    out_flat = pl.pallas_call(
        _make_scale_kernel(layout),
        out_shape=jax.ShapeDtypeStruct(x_flat.shape, x_flat.dtype),
        grid_spec=pltpu.PrefetchScalarGridSpec(
            num_scalar_prefetch=0,
            grid=(B, n_hw),
            in_specs=[pl.BlockSpec(x_block, x_index), scale_spec],
            out_specs=pl.BlockSpec(x_block, x_index),
        ),
        compiler_params=pltpu.CompilerParams(
            dimension_semantics=("parallel", "parallel"),
            vmem_limit_bytes=vmem_limit,
        ),
    )(x_flat, scale)
    return out_flat


def se_block(x_nchw, w1, b1, w2, b2, *, force_two_pass=False,
             hw_chunk_override=None):
    """SEBlock forward. x_nchw: (B, C, H, W); w1: (C, Cr); b1: (Cr,);
    w2: (Cr, C); b2: (C,). Returns x + x * sigmoid(fc(avg_pool(x))).
    The input x buffer is NOT aliased/clobbered (PyTorch semantics)."""
    B, C, H, W = x_nchw.shape
    HW = H * W
    Cr = w1.shape[1]
    dtype = x_nchw.dtype
    itemsize = jnp.dtype(dtype).itemsize

    # Excitation params are tiny; keep them f32 inside the kernel.
    w1 = w1.astype(jnp.float32)
    w2 = w2.astype(jnp.float32)
    b1_2d = b1.astype(jnp.float32).reshape(1, Cr)
    b2_2d = b2.astype(jnp.float32).reshape(1, C)
    use_mxu = Cr >= 8

    layout, hw_total = _choose_layout(C, HW)
    vmem_limit, tile_budget, tile_target = _vmem_budgets()
    bb, fits = _choose_block_batch(B, C, hw_total, itemsize,
                                   tile_budget, tile_target)
    two_pass = force_two_pass or not fits

    hw_chunk = None
    if two_pass:
        hw_chunk = hw_chunk_override or _choose_hw_chunk(
            C, HW, itemsize, tile_budget, tile_target, layout)
        hw_total = pl.cdiv(HW, hw_chunk) * hw_chunk

    # Flatten spatial; zero-pad HW if needed; transpose for the lane=C layout.
    x_flat = x_nchw.reshape(B, C, HW)
    if hw_total != HW:
        x_flat = jnp.pad(x_flat, ((0, 0), (0, 0), (0, hw_total - HW)))
    if layout == "hwc":
        # TODO(synk): in a full model keep activations NHWC end-to-end instead
        # of paying this wrapper-side transpose each call.
        x_flat = jnp.transpose(x_flat, (0, 2, 1))

    if two_pass:
        out_flat = _se_block_two_pass(
            x_flat, w1, b1_2d, w2, b2_2d, layout=layout, true_hw=HW,
            hw_chunk=hw_chunk, use_mxu=use_mxu, vmem_limit=vmem_limit)
    else:
        out_flat = _se_block_fused(
            x_flat, w1, b1_2d, w2, b2_2d, layout=layout, true_hw=HW, bb=bb,
            use_mxu=use_mxu, vmem_limit=vmem_limit)

    if layout == "hwc":
        out_flat = jnp.transpose(out_flat, (0, 2, 1))
    if hw_total != HW:
        out_flat = out_flat[:, :, :HW]
    return out_flat.reshape(B, C, H, W)


# ---------------------------------------------------------------------------
# Reference + self-test
# ---------------------------------------------------------------------------

def se_block_ref(x, w1, b1, w2, b2):
    x32 = x.astype(jnp.float32)
    pooled = jnp.mean(x32, axis=(2, 3))
    h = jnp.maximum(pooled @ w1.astype(jnp.float32) + b1.astype(jnp.float32), 0.0)
    s = jax.nn.sigmoid(h @ w2.astype(jnp.float32) + b2.astype(jnp.float32))
    return (x32 + x32 * s[:, :, None, None]).astype(x.dtype)


def _make_params(key, C, reduction):
    Cr = max(1, C // reduction)
    k1, k2, k3, k4 = jax.random.split(key, 4)
    w1 = jax.random.normal(k1, (C, Cr), dtype=jnp.float32) * 0.1
    b1 = jax.random.normal(k2, (Cr,), dtype=jnp.float32) * 0.1
    w2 = jax.random.normal(k3, (Cr, C), dtype=jnp.float32) * 0.1
    b2 = jax.random.normal(k4, (C,), dtype=jnp.float32) * 0.1
    return w1, b1, w2, b2


def _check(name, out, ref, atol, rtol):
    out = jax.block_until_ready(out)
    a = out.astype(jnp.float32)
    b = ref.astype(jnp.float32)
    err = float(jnp.max(jnp.abs(a - b)))
    assert jnp.allclose(a, b, atol=atol, rtol=rtol), \
        f"{name}: mismatch vs reference (max abs err {err})"


if __name__ == "__main__":
    key = jax.random.PRNGKey(0)
    kx, kp, kx2, kp2, kx3, kp3 = jax.random.split(key, 6)

    # Main case: B=2, C=32, 16x16, reduction=16 -> fused single-pass kernel,
    # (B, C, HW) layout (lane dim 256), grid of 2 batch steps.
    B, C, H, W, red = 2, 32, 16, 16, 16
    x = jax.random.normal(kx, (B, C, H, W), dtype=jnp.float32)
    w1, b1, w2, b2 = _make_params(kp, C, red)
    ref = se_block_ref(x, w1, b1, w2, b2)
    _check("fused f32 (B,C,HW)", se_block(x, w1, b1, w2, b2), ref, 1e-5, 1e-5)

    # Same shapes through the two-pass spatially-chunked fallback (the path
    # used when a single batch slab would not fit the VMEM budget).
    _check("two-pass fallback",
           se_block(x, w1, b1, w2, b2, force_two_pass=True,
                    hw_chunk_override=128),
           ref, 1e-5, 1e-5)

    # bf16 I/O: f32 accumulation inside the kernel, bf16 store.
    x_bf16 = x.astype(jnp.bfloat16)
    ref_bf16 = se_block_ref(x_bf16, w1, b1, w2, b2)
    _check("fused bf16", se_block(x_bf16, w1, b1, w2, b2), ref_bf16, 2e-2, 2e-2)

    # C % 128 == 0 with HW not a multiple of 128 -> (B, HW, C) layout.
    B2, C2, H2, W2, red2 = 2, 128, 5, 5, 16
    x2 = jax.random.normal(kx2, (B2, C2, H2, W2), dtype=jnp.float32)
    p2 = _make_params(kp2, C2, red2)
    _check("fused f32 (B,HW,C)", se_block(x2, *p2), se_block_ref(x2, *p2),
           1e-5, 1e-5)

    # Neither HW nor C a multiple of 128 -> zero-padded HW path.
    B3, C3, H3, W3, red3 = 3, 24, 5, 5, 4
    x3 = jax.random.normal(kx3, (B3, C3, H3, W3), dtype=jnp.float32)
    p3 = _make_params(kp3, C3, red3)
    _check("fused f32 padded HW", se_block(x3, *p3), se_block_ref(x3, *p3),
           1e-5, 1e-5)

    print("KERNEL_OK")
</pallas_src>

<mosaic_0001>
module attributes {stable_mosaic.version = 11 : i64} {
  func.func @kernel(%arg0: i32, %arg1: memref<1x32x256xf32, #tpu.memory_space<vmem>>, %arg2: memref<32x2xf32, #tpu.memory_space<vmem>>, %arg3: memref<1x2xf32, #tpu.memory_space<vmem>>, %arg4: memref<2x32xf32, #tpu.memory_space<vmem>>, %arg5: memref<1x32xf32, #tpu.memory_space<vmem>>, %arg6: memref<1x32x256xf32, #tpu.memory_space<vmem>>) attributes {dimension_semantics = [#tpu.dimension_semantics<parallel>], iteration_bounds = array<i64: 2>, scalar_prefetch = 0 : i64, scratch_operands = 0 : i64, tpu.core_type = #tpu.core_type<tc>, window_params = [{transform_indices = @transform_0, window_bounds = array<i64: 1, 32, 256>}, {pipeline_mode = #tpu.pipeline_mode<synchronous>, transform_indices = @transform_1, window_bounds = array<i64: 32, 2>}, {pipeline_mode = #tpu.pipeline_mode<synchronous>, transform_indices = @transform_2, window_bounds = array<i64: 1, 2>}, {pipeline_mode = #tpu.pipeline_mode<synchronous>, transform_indices = @transform_3, window_bounds = array<i64: 2, 32>}, {pipeline_mode = #tpu.pipeline_mode<synchronous>, transform_indices = @transform_4, window_bounds = array<i64: 1, 32>}, {transform_indices = @transform_5, window_bounds = array<i64: 1, 32, 256>}]} {
    %c0 = arith.constant 0 : index
    %c0_0 = arith.constant 0 : index
    %c0_1 = arith.constant 0 : index
    %0 = vector.load %arg1[%c0, %c0_0, %c0_1] : memref<1x32x256xf32, #tpu.memory_space<vmem>>, vector<1x32x256xf32>
    %cst = arith.constant dense<0.000000e+00> : vector<1x32xf32>
    %1 = vector.multi_reduction <add>, %0, %cst [2] : vector<1x32x256xf32> to vector<1x32xf32>
    %cst_2 = arith.constant 3.906250e-03 : f32
    %2 = vector.broadcast %cst_2 : f32 to vector<1x32xf32>
    %3 = arith.mulf %1, %2 : vector<1x32xf32>
    %c0_3 = arith.constant 0 : index
    %c0_4 = arith.constant 0 : index
    %4 = vector.load %arg2[%c0_3, %c0_4] : memref<32x2xf32, #tpu.memory_space<vmem>>, vector<32x2xf32>
    %c0_5 = arith.constant 0 : index
    %c0_6 = arith.constant 0 : index
    %5 = vector.load %arg3[%c0_5, %c0_6] : memref<1x2xf32, #tpu.memory_space<vmem>>, vector<1x2xf32>
    %c0_7 = arith.constant 0 : index
    %c0_8 = arith.constant 0 : index
    %6 = vector.load %arg4[%c0_7, %c0_8] : memref<2x32xf32, #tpu.memory_space<vmem>>, vector<2x32xf32>
    %c0_9 = arith.constant 0 : index
    %c0_10 = arith.constant 0 : index
    %7 = vector.load %arg5[%c0_9, %c0_10] : memref<1x32xf32, #tpu.memory_space<vmem>>, vector<1x32xf32>
    %8 = vector.shape_cast %3 : vector<1x32xf32> to vector<1x32x1xf32>
    %9 = vector.shape_cast %4 : vector<32x2xf32> to vector<1x32x2xf32>
    %10 = vector.broadcast %8 : vector<1x32x1xf32> to vector<1x32x2xf32>
    %11 = arith.mulf %10, %9 : vector<1x32x2xf32>
    %cst_11 = arith.constant dense<0.000000e+00> : vector<1x2xf32>
    %12 = vector.multi_reduction <add>, %11, %cst_11 [1] : vector<1x32x2xf32> to vector<1x2xf32>
    %13 = arith.addf %12, %5 : vector<1x2xf32>
    %cst_12 = arith.constant 0.000000e+00 : f32
    %14 = vector.broadcast %cst_12 : f32 to vector<1x2xf32>
    %15 = arith.maximumf %13, %14 : vector<1x2xf32>
    %16 = vector.shape_cast %15 : vector<1x2xf32> to vector<1x2x1xf32>
    %17 = vector.shape_cast %6 : vector<2x32xf32> to vector<1x2x32xf32>
    %18 = vector.broadcast %16 : vector<1x2x1xf32> to vector<1x2x32xf32>
    %19 = arith.mulf %18, %17 : vector<1x2x32xf32>
    %cst_13 = arith.constant dense<0.000000e+00> : vector<1x32xf32>
    %20 = vector.multi_reduction <add>, %19, %cst_13 [1] : vector<1x2x32xf32> to vector<1x32xf32>
    %21 = arith.addf %20, %7 : vector<1x32xf32>
    %cst_14 = arith.constant 0.000000e+00 : f32
    %22 = vector.broadcast %cst_14 : f32 to vector<1x32xf32>
    %23 = arith.subf %22, %21 : vector<1x32xf32>
    %24 = math.exp %23 : vector<1x32xf32>
    %cst_15 = arith.constant 1.000000e+00 : f32
    %25 = vector.broadcast %cst_15 : f32 to vector<1x32xf32>
    %26 = arith.addf %25, %24 : vector<1x32xf32>
    %cst_16 = arith.constant 1.000000e+00 : f32
    %27 = vector.broadcast %cst_16 : f32 to vector<1x32xf32>
    %28 = arith.divf %27, %26 : vector<1x32xf32>
    %cst_17 = arith.constant 1.000000e+00 : f32
    %29 = vector.broadcast %cst_17 : f32 to vector<1x32xf32>
    %30 = arith.addf %29, %28 : vector<1x32xf32>
    %c0_18 = arith.constant 0 : index
    %c0_19 = arith.constant 0 : index
    %c0_20 = arith.constant 0 : index
    %31 = vector.load %arg1[%c0_18, %c0_19, %c0_20] : memref<1x32x256xf32, #tpu.memory_space<vmem>>, vector<1x32x256xf32>
    %32 = vector.shape_cast %30 : vector<1x32xf32> to vector<1x32x1xf32>
    %33 = vector.broadcast %32 : vector<1x32x1xf32> to vector<1x32x256xf32>
    %34 = arith.mulf %31, %33 : vector<1x32x256xf32>
    %c0_21 = arith.constant 0 : index
    %c0_22 = arith.constant 0 : index
    %c0_23 = arith.constant 0 : index
    %35 = vector.load %arg6[%c0_21, %c0_22, %c0_23] : memref<1x32x256xf32, #tpu.memory_space<vmem>>, vector<1x32x256xf32>
    tpu.vector_store %arg6[%c0_21, %c0_22, %c0_23], %34 {strides = array<i32>} : memref<1x32x256xf32, #tpu.memory_space<vmem>>, vector<1x32x256xf32>,
    return
  }
  func.func @transform_0(%arg0: i32) -> (i32, i32, i32) {
    %c0_i32 = arith.constant 0 : i32
    %c0_i32_0 = arith.constant 0 : i32
    %c0_i32_1 = arith.constant 0 : i32
    return %arg0, %c0_i32, %c0_i32_0 : i32, i32, i32
  }
  func.func @transform_1(%arg0: i32) -> (i32, i32) {
    %c0_i32 = arith.constant 0 : i32
    %c0_i32_0 = arith.constant 0 : i32
    %c0_i32_1 = arith.constant 0 : i32
    return %c0_i32, %c0_i32_0 : i32, i32
  }
  func.func @transform_2(%arg0: i32) -> (i32, i32) {
    %c0_i32 = arith.constant 0 : i32
    %c0_i32_0 = arith.constant 0 : i32
    %c0_i32_1 = arith.constant 0 : i32
    return %c0_i32, %c0_i32_0 : i32, i32
  }
  func.func @transform_3(%arg0: i32) -> (i32, i32) {
    %c0_i32 = arith.constant 0 : i32
    %c0_i32_0 = arith.constant 0 : i32
    %c0_i32_1 = arith.constant 0 : i32
    return %c0_i32, %c0_i32_0 : i32, i32
  }
  func.func @transform_4(%arg0: i32) -> (i32, i32) {
    %c0_i32 = arith.constant 0 : i32
    %c0_i32_0 = arith.constant 0 : i32
    %c0_i32_1 = arith.constant 0 : i32
    return %c0_i32, %c0_i32_0 : i32, i32
  }
  func.func @transform_5(%arg0: i32) -> (i32, i32, i32) {
    %c0_i32 = arith.constant 0 : i32
    %c0_i32_0 = arith.constant 0 : i32
    %c0_i32_1 = arith.constant 0 : i32
    return %arg0, %c0_i32, %c0_i32_0 : i32, i32, i32
  }
}

</mosaic_0001>

<bundles_post_ra>
// kernel: tpu_custom_call.1
= control target key start
LH: loop header
LB: loop body
LE: loop exit
PB: predicated region body
PF: predicated region fallthrough
CT: control target
= control target key end

     0   :  { %10 = vsyncpa [#allocation3], 0  ;;  %s851_s0 = inlined_call_operand.hbm [shape: f32[2,32,256], index: 0, kind: input, shape index: {}]   ;;  %s852_s1 = inlined_call_operand.vmem [shape: f32[32,2], index: 1, kind: input, shape index: {}]   ;;  %s853_s2 = inlined_call_operand.vmem [shape: f32[1,2], index: 2, kind: input, shape index: {}]   ;;  %s854_s3 = inlined_call_operand.vmem [shape: f32[2,32], index: 3, kind: input, shape index: {}]   ;;  %s855_s4 = inlined_call_operand.vmem [shape: f32[1,32], index: 4, kind: input, shape index: {}]   ;;  %s856_s5 = inlined_call_operand.hbm [shape: f32[2,32,256], index: 5, kind: output, shape index: {}]  }
   0x1   :  { %12 = vsyncpa [#allocation3 + $0x1], 0 }
   0x2   :  { %13 = vsyncpa [#allocation4], 0 }
   0x3   :  { %15 = vsyncpa [#allocation4 + $0x1], 0  ;;  %s640_s18 = smov 0   ;;  %s642_s19 = smov 0  }
   0x4   :  { %s644_s20 = smov 0   ;;  %s646_s21 = smov 0  }
   0x5 LB: > { %s661_s22 = sadd.s32 4294967295, %s602_s21   ;;  %s440_s23 = sadd.s32 4294967294, %s602_s21   ;;  %s602_s21 = sphi %s646_s21, %s871_s21   ;;  %s598_s20 = sphi %s644_s20, %s870_s20   ;;  %s594_s19 = sphi %s642_s19, %s869_s19   ;;  %s590_s18 = sphi %s640_s18, %s868_s18  }
   0x6   : > { %s665_s24 = sadd.s32 1, %s602_s21   ;;  %s28_s25 = sadd.s32 1, %s598_s20 }
   0x7   : > { %s25_s26 = ssub.s32 %s602_s21, %s665_s24  ;;  %p35_p0 = scmp.ne.s32.totalorder %s598_s20, %s594_s19 }
   0x8   : > { %p26_p1 = scmp.eq.s32.totalorder %s25_s26, 0  ;;  %p36_p2 = scmp.eq.s32.totalorder %s602_s21, 0 }
   0x9   : > { %p41_p3 = scmp.ne.s32.totalorder %s594_s19, %s590_s18  ;;  %p42_p4 = scmp.eq.s32.totalorder %s661_s22, 0 }
   0xa   : > { %s677_s27 = scalar_select %p26_p1, %s598_s20, %s28_s25  }
   0xb   : > { %p679_p5 = por %p36_p2, %p35_p0  ;;  %p683_p6 = por %p42_p4, %p41_p3 }
   0xc   : > { %p149_p7 = scmp.eq.s32.totalorder %s661_s22, 1  ;;  %p155_p8 = scmp.eq.s32.totalorder %s440_s23, 1 }
   0xd   : > { %s860_s29 = scalar_select %p683_p6, 1, 0 }
   0xe   : > { %p468_p10 = scmp.lt.s32.totalorder %s602_s21, 2  ;;  %p690_p11 = por %p149_p7, %p35_p0 }
   0xf   : > { %p694_p12 = por %p155_p8, %p41_p3  ;;  %s187_s7 = sand.u32 1, %s598_s20  }
  0x10   : > { %s861_s30 = scalar_select %p690_p11, 1, 0 }
  0x11   : > { %s862_s6 = scalar_select %p694_p12, 1, 0 }
  0x12   : > { %s454_s8 = sshll.u32 %s602_s21, 10  ;;  %s443_s9 = sshll.u32 %s187_s7, 6 }
  0x13   : > { %s703_s12 = scalar_lea.hbm %s851_s0, %s454_s8  ;;  %s191_s13 = scalar_lea.vmem [#allocation2], %s443_s9 }
  0x14   : > { %s198_s14 = sshll.u32 %s191_s13, 4  ;;  %p707_p13 = pnand %p468_p10, %p679_p5  ;;  %s711_s14 = int_to_ptr.vmem [resolvable:$true] %s198_s14 }
  0x15   : > { %s713_s16 = scalar_lea.sflag [#allocation3], %s187_s7  ;;  %s510_s17 = scalar_lea.hbm %s703_s12, 1024 }
  0x16   : > { %p511_p0 = scmp.ne.s32.totalorder %s703_s12, %s510_s17  ;;  %p512_p1 = pneg %p707_p13 }
  0x17   : > { %s515_s26 = scalar_lea.hbm %s851_s0, 2048  ;;  %p516_p4 = scmp.lt.s32.totalorder %s703_s12, %s851_s0 }
  0x18   : > { %p513_p2 = pnand %p512_p1, %p511_p0  ;;  %p517_p5 = scmp.lt.s32.totalorder %s515_s26, %s510_s17 }
  0x1a   : > { %p514_p3 = pneg %p513_p2  ;;  %p518_p7 = por %p517_p5, %p516_p4 }
  0x1c   : > { %p519_p8 = pnand %p518_p7, %p514_p3 }
  0x1e   : > { %522 = shalt.err (!%p519_p8)
}
  0x1f   : > { %s523_s7 = scalar_lea.vmem %s711_s14, 1024  ;;  %s604_s9 = smov [#allocation2]  }
  0x20   : > { %p524_p10 = scmp.ne.s32.totalorder %s711_s14, %s523_s7  ;;  %s528_s10 = sshll.u32 %s604_s9, 4  ;;  %s529_s10 = int_to_ptr.vmem [resolvable:$false] %s528_s10 }
  0x21   : > { %s530_s11 = scalar_lea.vmem %s529_s10, 2048  ;;  %p531_p2 = scmp.lt.s32.totalorder %s711_s14, %s529_s10 }
  0x22   : > { %p526_p9 = pnand %p524_p10, %p512_p1  ;;  %p532_p12 = scmp.lt.s32.totalorder %s530_s11, %s523_s7 }
  0x24   : > { %p527_p0 = pneg %p526_p9  ;;  %p533_p11 = por %p532_p12, %p531_p2 }
  0x26   : > { %p534_p6 = pnand %p533_p11, %p527_p0 }
  0x28   : > { %537 = shalt.err (!%p534_p6)
}
  0x29   : > { %s605_s13 = smov 256   ;;  %s606_s17 = smov 16  }
  0x2a   : > { %463 = dma.hbm_to_vmem [thread:$0]  (!%p707_p13), %s703_s12, 1024, %s711_s14, %s713_s16, %s605_s13, %s605_s13, %s606_s17  }
  0x2b   : > { %p446_p9 = scmp.ge.s32.totalorder %s602_s21, 1  ;;  %p206_p1 = scmp.lt.s32.totalorder %s602_s21, 3 }
  0x2d   : > { %p207_p3 = pnand %p446_p9, %p206_p1 }
  0x2e   : > { %s737_s23 = sand.u32 (!%p207_p3), 1, %s594_s19   ;;  %p864_p6 = scmp.ne.s32.totalorder (!%p207_p3), %s860_s29, 0 }
  0x2f   : > { %210 = sbr.rel (%p207_p3) target bundleno = 536 (0x218), region = 40  ;;  %s447_s25 = sshll.u32 (!%p207_p3), %s737_s23, 6 }
  0x30   : > { %s213_s26 = scalar_lea.sflag (!%p207_p3), [#allocation3], %s737_s23  ;;  %s216_s28 = scalar_lea.vmem (!%p207_p3), [#allocation2], %s447_s25 }
  0x34   : > { %581 = dma.done.wait (%p864_p6), %s213_s26, 1024  }
  0x35   : > { %583 = vsyncadd (%p864_p6), %s213_s26, 4294966272  ;;  %v747_v0 = vld [vmem:[%s216_s28] sm:$0xff]  ;;  %v749_v1 = vld [vmem:[%s216_s28 + $0x8] sm:$0xff]  ;;  %vm278_vm0 = vcmask 15360   ;;  %v294_v38 = vlaneseq  ;;  %vm302_vm1 = vcmask 254976   ;;  %s242_s29 = scalar_lea.vmem [#allocation5], %s447_s25 }
  0x36   : > { %v751_v2 = vld [vmem:[%s216_s28 + $0x20] sm:$0xff]  ;;  %v251_v3 = vadd.f32 %v749_v1, %v747_v0  ;;  %v755_v4 = vld [vmem:[%s216_s28 + $0x28] sm:$0xff]  ;;  %v757_v5 = vld [vmem:[%s216_s28 + $0x10] sm:$0xff]  ;;  %s367_s12 = sshll.u32 %s242_s29, 4  ;;  %s455_s14 = sshll.u32 %s661_s22, 10  ;;  %s801_s12 = int_to_ptr.vmem [resolvable:$true] %s367_s12 }
  0x37   : > { %v759_v6 = vld [vmem:[%s216_s28 + $0x18] sm:$0xff]  ;;  %v257_v7 = vadd.f32 %v755_v4, %v751_v2  ;;  %v763_v8 = vld [vmem:[%s216_s28 + $0x30] sm:$0xff]  ;;  %v267_v15 = vld [vmem:[%s852_s1] sm:$0xff]  ;;  %v295_v41 = vshrl.u32 %v294_v38, 7  ;;  %s806_s16 = scalar_lea.hbm %s856_s5, %s455_s14  ;;  %s354_s22 = scalar_lea.sflag [#allocation4], %s737_s23 }
  0x38   : > { %v765_v9 = vld [vmem:[%s216_s28 + $0x38] sm:$0xff]  ;;  %252 = vadd.xlane.f32.xlu0 %v251_v3  ;;  %v254_v10 = vadd.f32 %v759_v6, %v757_v5  ;;  %v269_v17 = vld [vmem:[%s852_s1 + $0x10] sm:$0xff]  ;;  %v268_v18 = vld [vmem:[%s852_s1 + $0x8] sm:$0xff]  ;;  %s538_s8 = scalar_lea.vmem %s801_s12, 1024  ;;  %p865_p12 = scmp.ne.s32.totalorder %s861_s30, 0 }
  0x39   : > { %258 = vadd.xlane.f32.xlu1 %v257_v7  ;;  %v260_v11 = vadd.f32 %v765_v9, %v763_v8  ;;  %v270_v22 = vld [vmem:[%s852_s1 + $0x18] sm:$0xff]  ;;  %v271_v42 = vld [vmem:[%s853_s2] sm:$0x1]  ;;  %v296_v45 = vsub.s32 0, %v295_v41  ;;  %p539_p11 = scmp.ne.s32.totalorder %s801_s12, %s538_s8  ;;  %s607_s7 = smov [#allocation5]  }
  0x3a   : > { %v272_v48 = vld [vmem:[%s854_s3] sm:$0x3]  ;;  %s542_s9 = sshll.u32 %s607_s7, 4  ;;  %s543_s9 = int_to_ptr.vmem [resolvable:$false] %s542_s9 }
  0x3b   : > { %v273_v57 = vld [vmem:[%s855_s4] sm:$0x1]  ;;  %p540_p13 = pnand %p539_p11, %p865_p12  ;;  %s544_s10 = scalar_lea.vmem %s543_s9, 2048 }
  0x3c   : > { %255 = vadd.xlane.f32.xlu0 %v254_v10  ;;  %p545_p5 = scmp.lt.s32.totalorder %s801_s12, %s543_s9  ;;  %p546_p7 = scmp.lt.s32.totalorder %s544_s10, %s538_s8 }
  0x3d   : > { %261 = vadd.xlane.f32.xlu1 %v260_v11  ;;  %p541_p4 = pneg %p540_p13 }
  0x3e   : > { %p547_p8 = por %p546_p7, %p545_p5 }
  0x40   : > { %p548_p10 = pnand %p547_p8, %p541_p4 }
  0xc1   : > { %v253_v12 = vpop.xlane.xlu0 %252 }
  0xc2   : > { %v263_v13 = vmul.f32 0.00390625, %v253_v12  ;;  %v259_v14 = vpop.xlane.xlu1 %258 }
  0xc3   : > { %v265_v16 = vmul.f32 0.00390625, %v259_v14 }
  0xc4   : > { %v274_v20 = vmul.f32 %v267_v15, %v263_v13 }
  0xc5   : > { %v256_v19 = vpop.xlane.xlu0 %255  ;;  %v276_v25 = vmul.f32 %v269_v17, %v265_v16 }
  0xc6   : > { %v264_v21 = vmul.f32 0.00390625, %v256_v19  ;;  %v262_v23 = vpop.xlane.xlu1 %261  ;;  %v279_v28 = vsel %vm278_vm0, %v274_v20, 0.0 }
  0xc7   : > { %v266_v24 = vmul.f32 0.00390625, %v262_v23  ;;  %v282_v31 = vsel %vm278_vm0, %v276_v25, 0.0 }
  0xc8   : > { %v275_v26 = vmul.f32 %v268_v18, %v264_v21 }
  0xc9   : > { %v277_v27 = vmul.f32 %v270_v22, %v266_v24 }
  0xca   : > { %v280_v29 = vsel %vm278_vm0, %v275_v26, 0.0 }
  0xcb   : > { %v281_v30 = vadd.f32 %v280_v29, %v279_v28  ;;  %v284_v32 = vsel %vm278_vm0, %v277_v27, 0.0 }
  0xcd   : > { %v283_v33 = vadd.f32 %v282_v31, %v281_v30 }
  0xcf   : > { %v285_v34 = vadd.f32 %v284_v32, %v283_v33 }
  0xd1   : > { %v286_v35 = vrot.slane %v285_v34, 4 }
  0xd3   : > { %v287_v36 = vadd.f32 %v286_v35, %v285_v34 }
  0xd5   : > { %v288_v37 = vrot.slane %v287_v36, 2 }
  0xd7   : > { %v289_v39 = vadd.f32 %v288_v37, %v287_v36 }
  0xd9   : > { %v290_v40 = vrot.slane %v289_v39, 1 }
  0xdb   : > { %v291_v43 = vadd.f32 %v290_v40, %v289_v39 }
  0xdd   : > { %v292_v44 = vadd.f32 %v291_v43, %v271_v42 }
  0xdf   : > { %v293_v46 = vmax.f32 %v292_v44, 0.0 }
  0xe1   : > { %v297_v47 = vrot.slane %v293_v46, %v296_v45 }
  0xe3   : > { %299 = vbcast.lane.b32.xlu0 %v297_v47, 256 }
 0x155   : > { %v300_v49 = vpop.permute.xlu0 %299 }
 0x156   : > { %v301_v50 = vmul.f32 %v300_v49, %v272_v48 }
 0x158   : > { %v303_v51 = vsel %vm302_vm1, %v301_v50, 0.0 }
 0x159   : > { %v304_v52 = vrot.slane %v303_v51, 4 }
 0x15b   : > { %v305_v53 = vadd.f32 %v304_v52, %v303_v51 }
 0x15d   : > { %v306_v54 = vrot.slane %v305_v53, 2 }
 0x15f   : > { %v307_v55 = vadd.f32 %v306_v54, %v305_v53 }
 0x161   : > { %v308_v56 = vrot.slane %v307_v55, 1 }
 0x163   : > { %v309_v58 = vadd.f32 %v308_v56, %v307_v55 }
 0x165   : > { %v310_v59 = vadd.f32 %v309_v58, %v273_v57 }
 0x167   : > { %v311_v60 = vsub.f32 0.0, %v310_v59 }
 0x169   : > { %v312_v61 = vmul.f32 1.442695, %v311_v60 }
 0x16b   : > { %506 = vpow2.f32 %v312_v61 }
 0x178   : > { %v507_v62 = vpop.eup %506 }
 0x179   : > { %v314_v63 = vadd.f32 1.0, %v507_v62 }
 0x17b   : > { %508 = vrcp.f32 %v314_v63 }
 0x188   : > { %v509_v3 = vpop.eup %508 }
 0x189   : > { %v317_v7 = vadd.f32 1.0, %v509_v3 }
 0x18b   : > { %v321_v10 = vrot.slane %v317_v7, %v296_v45 }
 0x18d   : > { %335 = vbcast.lane.b32.xlu0 %v321_v10, 280  ;;  %323 = vbcast.lane.b32.xlu1 %v321_v10, 256 }
 0x191   : > { %327 = vbcast.lane.b32.xlu1 %v321_v10, 264 }
 0x195   : > { %331 = vbcast.lane.b32.xlu1 %v321_v10, 272 }
 0x1ff   : > { %v336_v11 = vpop.permute.xlu0 %335  ;;  %v324_v12 = vpop.permute.xlu1 %323 }
 0x200   : > { %v343_v13 = vmul.f32 %v336_v11, %v763_v8  ;;  %v344_v14 = vmul.f32 %v336_v11, %v765_v9  ;;  %v337_v15 = vmul.f32 %v324_v12, %v747_v0  ;;  %v338_v16 = vmul.f32 %v324_v12, %v749_v1 }
 0x202   : > { %351 = vst [vmem:[%s242_s29 + $0x30] sm:$0xff] %v343_v13  ;;  %352 = vst [vmem:[%s242_s29 + $0x38] sm:$0xff] %v344_v14 }
 0x203   : > { %345 = vst [vmem:[%s242_s29] sm:$0xff] %v337_v15  ;;  %346 = vst [vmem:[%s242_s29 + $0x8] sm:$0xff] %v338_v16  ;;  %v328_v17 = vpop.permute.xlu1 %327 }
 0x204   : > { %v339_v18 = vmul.f32 %v328_v17, %v757_v5  ;;  %v340_v8 = vmul.f32 %v328_v17, %v759_v6 }
 0x206   : > { %347 = vst [vmem:[%s242_s29 + $0x10] sm:$0xff] %v339_v18  ;;  %348 = vst [vmem:[%s242_s29 + $0x18] sm:$0xff] %v340_v8 }
 0x207   : > { %v332_v0 = vpop.permute.xlu1 %331 }
 0x208   : > { %v341_v1 = vmul.f32 %v332_v0, %v751_v2  ;;  %v342_v5 = vmul.f32 %v332_v0, %v755_v4 }
 0x20a   : > { %349 = vst [vmem:[%s242_s29 + $0x20] sm:$0xff] %v341_v1  ;;  %350 = vst [vmem:[%s242_s29 + $0x28] sm:$0xff] %v342_v5 }
 0x20b   : > { %551 = shalt.err (!%p548_p10)
}
 0x20c   : > { %s552_s11 = scalar_lea.hbm %s806_s16, 1024  ;;  %s556_s26 = scalar_lea.hbm %s856_s5, 2048 }
 0x20d   : > { %p553_p0 = scmp.ne.s32.totalorder %s806_s16, %s552_s11  ;;  %p557_p1 = scmp.lt.s32.totalorder %s806_s16, %s856_s5 }
 0x20e   : > { %p558_p3 = scmp.lt.s32.totalorder %s556_s26, %s552_s11 }
 0x20f   : > { %p554_p2 = pnand %p553_p0, %p865_p12 }
 0x210   : > { %p559_p6 = por %p558_p3, %p557_p1 }
 0x211   : > { %p555_p9 = pneg %p554_p2 }
 0x213   : > { %p560_p11 = pnand %p559_p6, %p555_p9 }
 0x215   : > { %563 = shalt.err (!%p560_p11)
}
 0x216   : > { %s608_s14 = smov 256   ;;  %s609_s25 = smov 16  }
 0x217   : > { %458 = dma.vmem_to_hbm [thread:$0]  (%p865_p12), %s801_s12, 1024, %s806_s16, %s354_s22, %s608_s14, %s608_s14, %s609_s25  }
 0x218 PF: > { %s382_s15 = sand.u32 1, %s590_s18   ;;  %p866_p13 = scmp.ne.s32.totalorder %s862_s6, 0 }
 0x219   : > { %p867_p4 = scmp.ge.s32.totalorder %s602_s21, 2  ;;  %s383_s8 = scalar_lea.sflag [#allocation4], %s382_s15 }
 0x21b   : > { %p465_p5 = pnand %p867_p4, %p866_p13 }
 0x21d   : > { %p466_p7 = pneg %p465_p5 }
 0x21f   : > { %585 = dma.done.wait (%p466_p7), %s383_s8, 1024  }
 0x220   : > { %587 = vsyncadd (%p466_p7), %s383_s8, 4294966272  ;;  %p18_p8 = scmp.ge.s32.totalorder %s665_s24, 4   ;;  %s868_s18 = smov %s594_s19 }
 0x221   : > { %s869_s19 = smov %s598_s20  ;;  %s870_s20 = smov %s677_s27 }
 0x222   : > { %s871_s21 = smov %s665_s24  ;;  %20 = sbr.rel (!%p18_p8) target bundleno = 5 (0x5), region = 85 }
 0x227   :  { %388 = vsyncpa [#allocation3], 1 }
 0x228   :  { %390 = vsyncpa [#allocation3 + $0x1], 1 }
 0x229   :  { %391 = vsyncpa [#allocation4], 1 }
 0x22a   :  { %393 = vsyncpa [#allocation4 + $0x1], 1 }

</bundles_post_ra>
